<compile_context>
chip_gen: v5e
topology: v5e:2x2
jax: 0.10.0
libtpu: 0.0.40
codegen_flags: <defaults>
</compile_context>

<pallas_src>
import jax
import jax.numpy as jnp
from jax.experimental import pallas as pl
from jax.experimental.pallas import tpu as pltpu


def _round_up(x, m):
    return (x + m - 1) // m * m


def moe_router_kernel(x_ref, w1_ref, b1_ref, w2_ref, b2_ref, o_ref):
    # INVARIANT: the last grid step may extend past the real token count; those
    # rows contain undefined data.  Every op below is strictly row-wise
    # (row-major matmuls + per-row softmax) and Pallas masks out-of-bounds rows
    # on writeback, so garbage rows can never contaminate valid outputs.  Do
    # NOT add cross-row reductions here without reinstating explicit padding.
    x = x_ref[...]                                               # [tile, d_model]
    # fc1 + ReLU: MXU matmul with f32 accumulation; bias add / ReLU in f32.
    h = jnp.dot(x, w1_ref[...], preferred_element_type=jnp.float32)
    h = jnp.maximum(h + b1_ref[...].astype(jnp.float32), 0.0)   # [tile, 2E]
    # fc2 (tiny N): feed the ReLU output at the weight dtype so v5e never has
    # to emulate an f32 matmul when the weights are bf16.
    logits = jnp.dot(h.astype(w2_ref.dtype), w2_ref[...],
                     preferred_element_type=jnp.float32)
    logits = logits + b2_ref[...].astype(jnp.float32)            # [tile, E]
    # Numerically stable row-wise softmax, all in f32 (v5e EUP/VPU lack bf16).
    m = jnp.max(logits, axis=-1, keepdims=True)
    e = jnp.exp(logits - m)
    denom = jnp.sum(e, axis=-1, keepdims=True)
    # Exact divide: kernel is HBM-bound so the divide is free, and rows sum to
    # 1 to f32 precision (an approx EUP reciprocal would not).
    o_ref[...] = (e / denom).astype(o_ref.dtype)


def moe_router(x, w1, b1, w2, b2, *, tile_n=None, out_dtype=jnp.float32):
    """relu(x @ w1 + b1) @ w2 + b2, softmax over the last (experts) dim.

    x : [..., d_model]           (pass bf16 for the ~2x memory-bound speedup)
    w1: [d_model, 2*num_experts], b1: [2*num_experts]
    w2: [2*num_experts, num_experts], b2: [num_experts]
    Weights are stored transposed vs. nn.Linear ([in, out]) so both matmuls
    are plain row-major MXU contractions.  Returns [..., num_experts].
    """
    d_model = x.shape[-1]
    hidden = w1.shape[-1]
    num_experts = w2.shape[-1]
    lead_shape = x.shape[:-1]

    b1 = b1.reshape(1, hidden)
    b2 = b2.reshape(1, num_experts)

    x2d = x.reshape(-1, d_model)
    n_tok = x2d.shape[0]
    itemsize = jnp.dtype(x2d.dtype).itemsize

    # ---- generation-aware VMEM limit ------------------------------------
    try:
        vmem_cap = pltpu.get_tpu_info().vmem_capacity_bytes
    except Exception:  # interpret mode / older runtimes
        vmem_cap = 128 * 1024 * 1024
    # ~75% of physical per-core VMEM: ≈48 MiB on v7x, ≈96 MiB on v5e/v6e.
    vmem_limit = max(min(int(vmem_cap * 0.75), 100 * 1024 * 1024),
                     32 * 1024 * 1024)

    # ---- tile selection ---------------------------------------------------
    if tile_n is None:
        small_vmem = vmem_cap <= 80 * 1024 * 1024       # v7x class (64 MiB/TC)
        tile_n = 512 if (small_vmem and itemsize >= 4) else 1024
    # Clamp so double-buffered x tiles + f32 intermediates fit in ~half the
    # limit; the other half covers the constant weight/bias blocks (which the
    # pipeliner may still double-buffer), the output block and compiler
    # scratch.  This is what keeps big-d_model f32 configs safe on v7x.
    row_bytes = 2 * d_model * itemsize + 8 * (hidden + num_experts)
    tile_cap = max(8, ((vmem_limit // 2) // row_bytes) // 8 * 8)
    tile_n = max(8, min(tile_n, tile_cap))

    # Pick the actual tile: multiple of 8 (or the full tiny token axis), and
    # at least 2 tiles when there is enough work so the "parallel" grid axis
    # can shard across v7x's two TensorCores.
    if n_tok < 8:
        tile = max(n_tok, 1)                       # block == full token axis
    elif n_tok < 16:
        tile = 8
    else:
        tile = min(tile_n, _round_up((n_tok + 1) // 2, 8))

    grid = (pl.cdiv(n_tok, tile),)
    rows_iter = grid[0] * tile                      # rows actually processed

    # ---- advisory cost estimate ------------------------------------------
    w_bytes = (w1.size * jnp.dtype(w1.dtype).itemsize
               + w2.size * jnp.dtype(w2.dtype).itemsize
               + b1.size * jnp.dtype(b1.dtype).itemsize
               + b2.size * jnp.dtype(b2.dtype).itemsize)
    cost = pl.CostEstimate(
        flops=2 * rows_iter * (d_model * hidden + hidden * num_experts),
        transcendentals=rows_iter * num_experts,        # exp per logit
        bytes_accessed=(rows_iter * d_model * itemsize            # x in
                        + n_tok * num_experts * jnp.dtype(out_dtype).itemsize
                        + w_bytes),
    )

    out = pl.pallas_call(
        moe_router_kernel,
        out_shape=jax.ShapeDtypeStruct((n_tok, num_experts), out_dtype),
        grid=grid,
        in_specs=[
            # token tile marches along the grid (auto-pipelined DMA)
            pl.BlockSpec((tile, d_model), lambda i: (i, 0)),
            # weights/biases: constant block index -> loaded once, VMEM-resident
            pl.BlockSpec((d_model, hidden), lambda i: (0, 0)),
            pl.BlockSpec((1, hidden), lambda i: (0, 0)),
            pl.BlockSpec((hidden, num_experts), lambda i: (0, 0)),
            pl.BlockSpec((1, num_experts), lambda i: (0, 0)),
        ],
        out_specs=pl.BlockSpec((tile, num_experts), lambda i: (i, 0)),
        compiler_params=pltpu.CompilerParams(
            dimension_semantics=("parallel",),          # megacore-shardable
            vmem_limit_bytes=vmem_limit,
        ),
        cost_estimate=cost,
    )(x2d, w1, b1, w2, b2)

    return out.reshape(*lead_shape, num_experts)


if __name__ == "__main__":
    # Small shapes consistent with the module: [batch, seq, d_model].
    batch, seq, d_model, num_experts = 2, 8, 32, 4
    hidden = num_experts * 2

    key = jax.random.PRNGKey(0)
    kx, kw1, kb1, kw2, kb2 = jax.random.split(key, 5)

    # bf16 activations/weights (the recommended fast path); f32 accumulation
    # and f32 softmax happen inside the kernel.
    x = jax.random.normal(kx, (batch, seq, d_model), jnp.float32).astype(jnp.bfloat16)
    w1 = (jax.random.normal(kw1, (d_model, hidden), jnp.float32) * 0.1).astype(jnp.bfloat16)
    b1 = (jax.random.normal(kb1, (hidden,), jnp.float32) * 0.1).astype(jnp.bfloat16)
    w2 = (jax.random.normal(kw2, (hidden, num_experts), jnp.float32) * 0.1).astype(jnp.bfloat16)
    b2 = (jax.random.normal(kb2, (num_experts,), jnp.float32) * 0.1).astype(jnp.bfloat16)

    out = moe_router(x, w1, b1, w2, b2)
    out = jax.block_until_ready(out)

    # Reference in plain JAX / f32 (same forward semantics as the PyTorch module),
    # computed from the same bf16-valued parameters.
    xf = x.astype(jnp.float32).reshape(-1, d_model)
    h_ref = jnp.maximum(xf @ w1.astype(jnp.float32) + b1.astype(jnp.float32)[None, :], 0.0)
    logits_ref = h_ref @ w2.astype(jnp.float32) + b2.astype(jnp.float32)[None, :]
    ref = jax.nn.softmax(logits_ref, axis=-1).reshape(batch, seq, num_experts)

    assert out.shape == (batch, seq, num_experts), "bad output shape"
    assert out.dtype == jnp.float32, "probabilities should come out in f32"
    # Tolerance covers the bf16 matmul inputs (f32 accumulation inside).
    assert jnp.allclose(out, ref, atol=2e-2, rtol=2e-2), "mismatch vs reference"
    # Exact divide in the kernel -> rows sum to 1 to f32 precision.
    assert jnp.allclose(jnp.sum(out, axis=-1), 1.0, atol=1e-3), "softmax rows must sum to 1"

    print("KERNEL_OK")
</pallas_src>

<mosaic_0001>
module attributes {stable_mosaic.version = 11 : i64} {
  func.func @moe_router_kernel(%arg0: i32, %arg1: memref<8x32xbf16, #tpu.memory_space<vmem>>, %arg2: memref<32x8xbf16, #tpu.memory_space<vmem>>, %arg3: memref<1x8xbf16, #tpu.memory_space<vmem>>, %arg4: memref<8x4xbf16, #tpu.memory_space<vmem>>, %arg5: memref<1x4xbf16, #tpu.memory_space<vmem>>, %arg6: memref<8x4xf32, #tpu.memory_space<vmem>>) attributes {dimension_semantics = [#tpu.dimension_semantics<parallel>], iteration_bounds = array<i64: 2>, scalar_prefetch = 0 : i64, scratch_operands = 0 : i64, tpu.core_type = #tpu.core_type<tc>, window_params = [{transform_indices = @transform_0, window_bounds = array<i64: 8, 32>}, {pipeline_mode = #tpu.pipeline_mode<synchronous>, transform_indices = @transform_1, window_bounds = array<i64: 32, 8>}, {pipeline_mode = #tpu.pipeline_mode<synchronous>, transform_indices = @transform_2, window_bounds = array<i64: 1, 8>}, {pipeline_mode = #tpu.pipeline_mode<synchronous>, transform_indices = @transform_3, window_bounds = array<i64: 8, 4>}, {pipeline_mode = #tpu.pipeline_mode<synchronous>, transform_indices = @transform_4, window_bounds = array<i64: 1, 4>}, {transform_indices = @transform_5, window_bounds = array<i64: 8, 4>}]} {
    %c0 = arith.constant 0 : index
    %c0_0 = arith.constant 0 : index
    %0 = vector.load %arg1[%c0, %c0_0] : memref<8x32xbf16, #tpu.memory_space<vmem>>, vector<8x32xbf16>
    %c0_1 = arith.constant 0 : index
    %c0_2 = arith.constant 0 : index
    %1 = vector.load %arg2[%c0_1, %c0_2] : memref<32x8xbf16, #tpu.memory_space<vmem>>, vector<32x8xbf16>
    %cst = arith.constant dense<0.000000e+00> : vector<8x8xf32>
    %2 = tpu.matmul %0, %1, %cst {dimension_numbers = #tpu.dot_dimension_numbers<[1], [0], [0], [1], [0, 0, 1, 1], [], []>} : vector<8x32xbf16>, vector<32x8xbf16>, vector<8x8xf32> -> vector<8x8xf32>
    %c0_3 = arith.constant 0 : index
    %c0_4 = arith.constant 0 : index
    %3 = vector.load %arg3[%c0_3, %c0_4] : memref<1x8xbf16, #tpu.memory_space<vmem>>, vector<1x8xbf16>
    %4 = arith.extf %3 : vector<1x8xbf16> to vector<1x8xf32>
    %5 = vector.broadcast %4 : vector<1x8xf32> to vector<8x8xf32>
    %6 = arith.addf %2, %5 : vector<8x8xf32>
    %cst_5 = arith.constant 0.000000e+00 : f32
    %7 = vector.broadcast %cst_5 : f32 to vector<8x8xf32>
    %8 = arith.maximumf %6, %7 : vector<8x8xf32>
    %9 = arith.truncf %8 : vector<8x8xf32> to vector<8x8xbf16>
    %c0_6 = arith.constant 0 : index
    %c0_7 = arith.constant 0 : index
    %10 = vector.load %arg4[%c0_6, %c0_7] : memref<8x4xbf16, #tpu.memory_space<vmem>>, vector<8x4xbf16>
    %cst_8 = arith.constant dense<0.000000e+00> : vector<8x4xf32>
    %11 = tpu.matmul %9, %10, %cst_8 {dimension_numbers = #tpu.dot_dimension_numbers<[1], [0], [0], [1], [0, 0, 1, 1], [], []>} : vector<8x8xbf16>, vector<8x4xbf16>, vector<8x4xf32> -> vector<8x4xf32>
    %c0_9 = arith.constant 0 : index
    %c0_10 = arith.constant 0 : index
    %12 = vector.load %arg5[%c0_9, %c0_10] : memref<1x4xbf16, #tpu.memory_space<vmem>>, vector<1x4xbf16>
    %13 = arith.extf %12 : vector<1x4xbf16> to vector<1x4xf32>
    %14 = vector.broadcast %13 : vector<1x4xf32> to vector<8x4xf32>
    %15 = arith.addf %11, %14 : vector<8x4xf32>
    %cst_11 = arith.constant dense<0xFF800000> : vector<8xf32>
    %16 = vector.multi_reduction <maximumf>, %15, %cst_11 [1] : vector<8x4xf32> to vector<8xf32>
    %17 = vector.shape_cast %16 : vector<8xf32> to vector<8x1xf32>
    %18 = vector.broadcast %17 : vector<8x1xf32> to vector<8x4xf32>
    %19 = arith.subf %15, %18 : vector<8x4xf32>
    %20 = math.exp %19 : vector<8x4xf32>
    %cst_12 = arith.constant dense<0.000000e+00> : vector<8xf32>
    %21 = vector.multi_reduction <add>, %20, %cst_12 [1] : vector<8x4xf32> to vector<8xf32>
    %22 = vector.shape_cast %21 : vector<8xf32> to vector<8x1xf32>
    %23 = vector.broadcast %22 : vector<8x1xf32> to vector<8x4xf32>
    %24 = arith.divf %20, %23 : vector<8x4xf32>
    %c0_13 = arith.constant 0 : index
    %c0_14 = arith.constant 0 : index
    %25 = vector.load %arg6[%c0_13, %c0_14] : memref<8x4xf32, #tpu.memory_space<vmem>>, vector<8x4xf32>
    tpu.vector_store %arg6[%c0_13, %c0_14], %24 {strides = array<i32>} : memref<8x4xf32, #tpu.memory_space<vmem>>, vector<8x4xf32>,
    return
  }
  func.func @transform_0(%arg0: i32) -> (i32, i32) {
    %c0_i32 = arith.constant 0 : i32
    %c0_i32_0 = arith.constant 0 : i32
    return %arg0, %c0_i32 : i32, i32
  }
  func.func @transform_1(%arg0: i32) -> (i32, i32) {
    %c0_i32 = arith.constant 0 : i32
    %c0_i32_0 = arith.constant 0 : i32
    %c0_i32_1 = arith.constant 0 : i32
    return %c0_i32, %c0_i32_0 : i32, i32
  }
  func.func @transform_2(%arg0: i32) -> (i32, i32) {
    %c0_i32 = arith.constant 0 : i32
    %c0_i32_0 = arith.constant 0 : i32
    %c0_i32_1 = arith.constant 0 : i32
    return %c0_i32, %c0_i32_0 : i32, i32
  }
  func.func @transform_3(%arg0: i32) -> (i32, i32) {
    %c0_i32 = arith.constant 0 : i32
    %c0_i32_0 = arith.constant 0 : i32
    %c0_i32_1 = arith.constant 0 : i32
    return %c0_i32, %c0_i32_0 : i32, i32
  }
  func.func @transform_4(%arg0: i32) -> (i32, i32) {
    %c0_i32 = arith.constant 0 : i32
    %c0_i32_0 = arith.constant 0 : i32
    %c0_i32_1 = arith.constant 0 : i32
    return %c0_i32, %c0_i32_0 : i32, i32
  }
  func.func @transform_5(%arg0: i32) -> (i32, i32) {
    %c0_i32 = arith.constant 0 : i32
    %c0_i32_0 = arith.constant 0 : i32
    return %arg0, %c0_i32 : i32, i32
  }
}

</mosaic_0001>

<bundles_post_ra>
// kernel: tpu_custom_call.1
= control target key start
LH: loop header
LB: loop body
LE: loop exit
PB: predicated region body
PF: predicated region fallthrough
CT: control target
= control target key end

     0   :  { %s435_s18 = smov 0   ;;  %s474_s0 = inlined_call_operand.vmem [shape: bf16[16,32], index: 0, kind: input, shape index: {}]   ;;  %s475_s1 = inlined_call_operand.vmem [shape: bf16[32,8], index: 1, kind: input, shape index: {}]   ;;  %s476_s2 = inlined_call_operand.vmem [shape: bf16[1,8], index: 2, kind: input, shape index: {}]   ;;  %s477_s3 = inlined_call_operand.vmem [shape: bf16[8,4], index: 3, kind: input, shape index: {}]   ;;  %s478_s4 = inlined_call_operand.vmem [shape: bf16[1,4], index: 4, kind: input, shape index: {}]   ;;  %s479_s5 = inlined_call_operand.vmem [shape: f32[16,4], index: 5, kind: output, shape index: {}]  }
   0x1 LB: > { %s364_s19 = sadd.s32 4294967295, %s403_s18   ;;  %p368_p0 = scmp.ge.s32.totalorder %s403_s18, 1  ;;  %s403_s18 = sphi %s435_s18, %s15_s18  }
   0x2   : > { %p186_p1 = scmp.lt.s32.totalorder %s403_s18, 3 }
   0x4   : > { %p187_p2 = pnand %p368_p0, %p186_p1 }
   0x5   : > { %p212_p3 = scmp.lt.s32.totalorder (!%p187_p2), %s364_s19, 1 }
   0x6   : > { %190 = sbr.rel (%p187_p2) target bundleno = 544 (0x220), region = 40 }
   0xb   : > { %v384_v0 = vld [vmem:[%s475_s1 + $0x8] sm:$0xff]  ;;  %v383_v1 = vld [vmem:[%s475_s1] sm:$0xff]  ;;  %s481_s19 = smov (!%p212_p3, %s364_s19), 1  ;;  %vm241_vm0 = vcmask 261120   ;;  %vm268_vm1 = vcmask 1043456   ;;  %vm264_vm2 = vcmask 64512  }
   0xc   : > { %251 = vmatpush.bf16.msra.mxu0 %v384_v0  ;;  %s369_s24 = sshll.u32 %s481_s19, 2  ;;  %v260_v3 = vld [vmem:[%s477_s3] sm:$0xf]  ;;  %vm285_vm3 = vcmask 31744   ;;  %s370_s9 = sshll.u32 %s481_s19, 3 }
   0xd   : > { %s215_s27 = scalar_lea.vmem %s474_s0, %s369_s24  ;;  %v270_v4 = vsel %vm268_vm1, %v260_v3, 0  ;;  %v226_v5 = vld [vmem:[%s476_s2] sm:$0x1]  ;;  %s219_s12 = scalar_lea.vmem %s479_s5, %s370_s9 }
   0xe   : > { %v221_v2 = vld [vmem:[%s215_s27] sm:$0xf]  ;;  %279 = vmatpush.bf16.msra.mxu1 %v270_v4  ;;  %v227_v6 = vunpack.c.l.bf16 %v226_v5 }
   0xf   : > { %v261_v13 = vld [vmem:[%s478_s4] sm:$0x1] }
  0x10   : > { %252 = vmatpush.bf16.msra.mxu0 %v383_v1  ;;  %v228_v7 = vperm.slane %v227_v6, 0  ;;  %v262_v14 = vunpack.c.l.bf16 %v261_v13 }
  0x12   : > { %v263_v15 = vperm.slane %v262_v14, 0 }
  0x13   : > { %379 = vmatmul.msk.bf16.vlgmr.msra.gmra.mxu0 %vm241_vm0, %v221_v2 }
  0x90   : > { %v254_v8 = vpop.f32.mrf.mxu0 }
  0x91   : > { %v255_v9 = vadd.f32 %v254_v8, %v228_v7 }
  0x93   : > { %v258_v10 = vmax.f32 %v255_v9, 0.0 }
  0x95   : > { %v259_v11 = vpack.c.bf16 %v258_v10, %v258_v10 }
  0x97   : > { %380 = vmatmul.msk.bf16.vlgmr.msra.gmra.mxu1 %vm264_vm2, %v259_v11 }
  0x98   : > { %v256_v12 = vpop.f32.mrf.mxu0 }
 0x114   : > { %v281_v16 = vpop.f32.mrf.mxu1 }
 0x115   : > { %v282_v17 = vadd.f32 %v281_v16, %v263_v15 }
 0x117   : > { %v286_v18 = vsel %vm285_vm3, %v282_v17, -inf }
 0x118   : > { %287 = vmax.xlane.f32.xlu0 %v286_v18 }
 0x11c   : > { %v283_v19 = vpop.f32.mrf.mxu1 }
 0x18b   : > { %v288_v20 = vpop.xlane.xlu0 %287 }
 0x18c   : > { %v289_v21 = vsub.f32 %v282_v17, %v288_v20 }
 0x18e   : > { %v290_v22 = vmul.f32 1.442695, %v289_v21 }
 0x190   : > { %393 = vpow2.f32 %v290_v22 }
 0x196   : > { %v394_v23 = vpop.eup %393 }
 0x197   : > { %v292_v24 = vsel %vm285_vm3, %v394_v23, 0.0 }
 0x198   : > { %293 = vadd.xlane.f32.xlu0 %v292_v24 }
 0x20b   : > { %v294_v25 = vpop.xlane.xlu0 %293 }
 0x20c   : > { %395 = vrcp.f32 %v294_v25  ;;  %v306_v29 = vand.u32 2147483648, %v294_v25  ;;  %v304_v31 = vand.u32 2147483647, %v294_v25  ;;  %vm300_vm5 = vweird.f32 %v294_v25 }
 0x20e   : > { %v307_v33 = vor.u32 1.1754944e-38, %v306_v29  ;;  %vm305_vm7 = vcmp.eq.f32.partialorder %v304_v31, 8.507059e+37 }
 0x212   : > { %v396_v26 = vpop.eup %395 }
 0x213   : > { %v296_v27 = vmul.f32 %v396_v26, %v294_v25  ;;  %vm301_vm4 = vweird.f32 %v396_v26 }
 0x214   : > { %vm302_vm6 = vmor %vm300_vm5, %vm301_vm4 }
 0x215   : > { %v297_v28 = vsub.f32 1.0, %v296_v27 }
 0x217   : > { %v298_v30 = vmul.f32 %v396_v26, %v297_v28 }
 0x219   : > { %v299_v32 = vadd.f32 %v396_v26, %v298_v30 }
 0x21b   : > { %v303_v34 = vsel %vm302_vm6, %v396_v26, %v299_v32 }
 0x21c   : > { %v308_v35 = vsel %vm305_vm7, %v307_v33, %v303_v34 }
 0x21d   : > { %v309_v36 = vmul.f32 %v394_v23, %v308_v35 }
 0x21f   : > { %310 = vst.msk [vmem:[%s219_s12] sm:$0xff] %vm285_vm3, %v309_v36 }
 0x220 PF: > { %s15_s18 = sadd.s32 1, %s403_s18  }
 0x221   : > { %p12_p4 = scmp.ge.s32.totalorder %s15_s18, 4  }
 0x223   :  { %14 = sbr.rel (!%p12_p4) target bundleno = 1 (0x1), region = 70 }

</bundles_post_ra>
